<compile_context>
chip_gen: v5e
topology: v5e:2x2
jax: 0.10.0
libtpu: 0.0.40
codegen_flags: <defaults>
</compile_context>

<pallas_src>
import functools

import jax
import jax.numpy as jnp
from jax.experimental import pallas as pl
from jax.experimental.pallas import tpu as pltpu


def _make_pooling_kernel(mode: str):
    """Builds the batched pooling kernel body."""

    def kernel(len_ref, seq_ref, out_ref):
        # len_ref: (BB, 1) int32 VMEM block of valid lengths
        # seq_ref: (BB, T, E) VMEM tile (native dtype)
        # out_ref: (BB, E) VMEM tile (lane/sublane-dense output slab)
        lengths = len_ref[...]                       # (BB, 1) int32
        seq = seq_ref[...]                           # (BB, T, E)
        bb, t, _ = seq.shape

        # valid[b, t, 0] = t < lengths[b]
        t_idx = jax.lax.broadcasted_iota(jnp.int32, (bb, t, 1), 1)
        valid = t_idx < lengths[:, :, None]          # (BB, T, 1) bool

        if mode == "max":
            neg = jnp.asarray(-1e9, dtype=seq.dtype)
            out = jnp.max(jnp.where(valid, seq, neg), axis=1)        # (BB, E)
        else:
            zero = jnp.zeros((), dtype=seq.dtype)
            # accumulate in f32 regardless of input dtype
            out = jnp.sum(jnp.where(valid, seq, zero), axis=1,
                          dtype=jnp.float32)                          # (BB, E)
            if mode == "mean":
                out = out / (lengths.astype(jnp.float32) + 1e-8)      # (BB,1) bcast

        out_ref[...] = out.astype(out_ref.dtype)

    return kernel


def _choose_block_b(B, T, E, itemsize):
    """Pick the batch-block size BB (static, from shapes)."""
    row_bytes = max(1, T * E * itemsize)
    budget = 8 << 20                       # ~8 MiB per input buffer (x2 double-buffered)
    bb = max(1, budget // row_bytes)
    bb = max(8, (bb // 8) * 8)             # sublane-aligned
    bb = min(bb, 1024)
    b_ceil8 = ((B + 7) // 8) * 8
    # keep >= 2 grid steps when there's enough work (v7x megacore)
    if b_ceil8 >= 16:
        half = ((b_ceil8 // 2 + 7) // 8) * 8
        bb = min(bb, max(8, half))
    return min(bb, b_ceil8)


@functools.partial(jax.jit, static_argnames=("mode",))
def sequence_pooling(seq, lengths, mode="mean"):
    """Pallas equivalent of SequencePoolingLayer(mode).forward((seq, lengths)).

    seq:     (B, T, E) float array
    lengths: (B,) or (B, 1) int array of valid sequence lengths
    returns: (B, 1, E) array, same dtype as seq
    """
    if mode not in ("sum", "mean", "max"):
        raise ValueError("parameter mode should in [sum, mean, max]")
    B, T, E = seq.shape
    itemsize = jnp.dtype(seq.dtype).itemsize
    lengths = lengths.astype(jnp.int32).reshape(B, 1)

    bb = _choose_block_b(B, T, E, itemsize)
    num_blocks = pl.cdiv(B, bb)
    b_pad = num_blocks * bb
    if b_pad != B:
        seq = jnp.pad(seq, ((0, b_pad - B), (0, 0), (0, 0)))
        lengths = jnp.pad(lengths, ((0, b_pad - B), (0, 0)), constant_values=1)

    out_flat = pl.pallas_call(
        _make_pooling_kernel(mode),
        out_shape=jax.ShapeDtypeStruct((b_pad, E), seq.dtype),
        grid=(num_blocks,),
        in_specs=[
            # lengths: per-step (BB, 1) VMEM block
            pl.BlockSpec((bb, 1), lambda i: (i, 0)),
            # seq: BB batch rows per grid step, full (T, E) per row
            pl.BlockSpec((bb, T, E), lambda i: (i, 0, 0)),
        ],
        out_specs=pl.BlockSpec((bb, E), lambda i: (i, 0)),
        compiler_params=pltpu.CompilerParams(
            dimension_semantics=("parallel",)
        ),
        cost_estimate=pl.CostEstimate(
            flops=2 * b_pad * T * E,
            transcendentals=0,
            bytes_accessed=(b_pad * T * E * itemsize      # seq read
                            + b_pad * 4                   # lengths read
                            + b_pad * E * itemsize),      # output write
        ),
    )(lengths, seq)

    # (B_pad, E) -> (B, 1, E), matching PyTorch's unsqueeze(1)/keepdim output.
    return out_flat[:B, None, :]


def _reference(seq, lengths, mode):
    """Pure-JAX reference mirroring the PyTorch forward (non-masking path)."""
    B, T, E = seq.shape
    lengths = lengths.astype(jnp.int32).reshape(B, 1)
    t_idx = jnp.arange(T)[None, :, None]                        # (1, T, 1)
    mask = (t_idx < lengths[:, :, None]).astype(jnp.float32)    # (B, T, 1)
    mask = jnp.broadcast_to(mask, (B, T, E))                    # (B, T, E)
    if mode == "max":
        hist = seq.astype(jnp.float32) - (1.0 - mask) * 1e9
        return jnp.max(hist, axis=1, keepdims=True).astype(seq.dtype)
    hist = jnp.sum(seq.astype(jnp.float32) * mask, axis=1)      # (B, E)
    if mode == "mean":
        hist = hist / (lengths.astype(jnp.float32) + 1e-8)
    return hist[:, None, :].astype(seq.dtype)


if __name__ == "__main__":
    key = jax.random.PRNGKey(0)
    ok = True
    # small case (single block) and a padded / multi-block case
    for (B, T, E) in ((2, 8, 32), (20, 16, 128)):
        k_seq, k_len, key = jax.random.split(key, 3)
        seq = jax.random.normal(k_seq, (B, T, E), dtype=jnp.float32)
        lengths = jax.random.randint(k_len, (B,), minval=1, maxval=T + 1)
        for mode in ("mean", "sum", "max"):
            out = jax.block_until_ready(sequence_pooling(seq, lengths, mode=mode))
            ref = _reference(seq, lengths, mode)
            assert out.shape == (B, 1, E), (mode, out.shape)
            ok &= bool(jnp.allclose(out, ref, atol=1e-5, rtol=1e-5))

    if ok:
        print("KERNEL_OK")
</pallas_src>

<mosaic_0001>
module attributes {stable_mosaic.version = 11 : i64} {
  func.func @kernel(%arg0: i32, %arg1: memref<8x1xi32, #tpu.memory_space<vmem>>, %arg2: memref<8x8x32xf32, #tpu.memory_space<vmem>>, %arg3: memref<8x32xf32, #tpu.memory_space<vmem>>) attributes {dimension_semantics = [#tpu.dimension_semantics<parallel>], iteration_bounds = array<i64: 1>, scalar_prefetch = 0 : i64, scratch_operands = 0 : i64, tpu.core_type = #tpu.core_type<tc>, window_params = [{transform_indices = @transform_0, window_bounds = array<i64: 8, 1>}, {transform_indices = @transform_1, window_bounds = array<i64: 8, 8, 32>}, {transform_indices = @transform_2, window_bounds = array<i64: 8, 32>}]} {
    %c0 = arith.constant 0 : index
    %c0_0 = arith.constant 0 : index
    %0 = vector.load %arg1[%c0, %c0_0] : memref<8x1xi32, #tpu.memory_space<vmem>>, vector<8x1xi32>
    %c0_1 = arith.constant 0 : index
    %c0_2 = arith.constant 0 : index
    %c0_3 = arith.constant 0 : index
    %1 = vector.load %arg2[%c0_1, %c0_2, %c0_3] : memref<8x8x32xf32, #tpu.memory_space<vmem>>, vector<8x8x32xf32>
    %2 = tpu.iota {dimensions = array<i32: 1>} : vector<8x8x1xi32>
    %3 = vector.shape_cast %0 : vector<8x1xi32> to vector<8x1x1xi32>
    %4 = vector.broadcast %3 : vector<8x1x1xi32> to vector<8x8x1xi32>
    %5 = arith.cmpi slt, %2, %4 : vector<8x8x1xi32>
    %cst = arith.constant 0.000000e+00 : f32
    %6 = vector.shape_cast %5 : vector<8x8x1xi1> to vector<8x8x1xi1>
    %7 = vector.broadcast %6 : vector<8x8x1xi1> to vector<8x8x32xi1>
    %8 = vector.broadcast %cst : f32 to vector<8x8x32xf32>
    %9 = arith.select %7, %1, %8 : vector<8x8x32xi1>, vector<8x8x32xf32>
    %cst_4 = arith.constant dense<0.000000e+00> : vector<8x32xf32>
    %10 = vector.multi_reduction <add>, %9, %cst_4 [1] : vector<8x8x32xf32> to vector<8x32xf32>
    %11 = arith.sitofp %0 : vector<8x1xi32> to vector<8x1xf32>
    %cst_5 = arith.constant 9.99999993E-9 : f32
    %12 = vector.broadcast %cst_5 : f32 to vector<8x1xf32>
    %13 = arith.addf %11, %12 : vector<8x1xf32>
    %14 = vector.broadcast %13 : vector<8x1xf32> to vector<8x32xf32>
    %15 = arith.divf %10, %14 : vector<8x32xf32>
    %c0_6 = arith.constant 0 : index
    %c0_7 = arith.constant 0 : index
    %16 = vector.load %arg3[%c0_6, %c0_7] : memref<8x32xf32, #tpu.memory_space<vmem>>, vector<8x32xf32>
    tpu.vector_store %arg3[%c0_6, %c0_7], %15 {strides = array<i32>} : memref<8x32xf32, #tpu.memory_space<vmem>>, vector<8x32xf32>,
    return
  }
  func.func @transform_0(%arg0: i32) -> (i32, i32) {
    %c0_i32 = arith.constant 0 : i32
    %c0_i32_0 = arith.constant 0 : i32
    return %arg0, %c0_i32 : i32, i32
  }
  func.func @transform_1(%arg0: i32) -> (i32, i32, i32) {
    %c0_i32 = arith.constant 0 : i32
    %c0_i32_0 = arith.constant 0 : i32
    %c0_i32_1 = arith.constant 0 : i32
    return %arg0, %c0_i32, %c0_i32_0 : i32, i32, i32
  }
  func.func @transform_2(%arg0: i32) -> (i32, i32) {
    %c0_i32 = arith.constant 0 : i32
    %c0_i32_0 = arith.constant 0 : i32
    return %arg0, %c0_i32 : i32, i32
  }
}

</mosaic_0001>

<bundles_post_ra>
// kernel: sequence_pooling.1
= control target key start
LH: loop header
LB: loop body
LE: loop exit
PB: predicated region body
PF: predicated region fallthrough
CT: control target
= control target key end

     0   :  { %v20_v0 = vlaneseq  ;;  %v346_v1 = vmov 0   ;;  %vm93_vm9 = vcmask 261120   ;;  %s613_s0 = inlined_call_operand.vmem [shape: s32[8,1], index: 0, kind: input, shape index: {}]   ;;  %s614_s1 = inlined_call_operand.vmem [shape: f32[8,8,32], index: 1, kind: input, shape index: {}]   ;;  %s615_s2 = inlined_call_operand.vmem [shape: f32[8,32], index: 2, kind: output, shape index: {}]  }
   0x1   :  { %328 = vset.pattern.permute.xlu1 %v346_v1  ;;  %327 = vset.pattern.permute.xlu0 %v346_v1  ;;  %v11_v2 = vld [vmem:[%s613_s0] sm:$0xff]  ;;  %v15_v31 = vld [vmem:[%s614_s1 + $0x18] sm:$0xff]  ;;  %v14_v54 = vld [vmem:[%s614_s1 + $0x10] sm:$0xff] }
   0x2   :  { %v150_v3 = vcvt.s32.f32 %v11_v2  ;;  %v21_v4 = vshrl.u32 %v20_v0, 7  ;;  %v29_v5 = vperm.slane %v11_v2, 0  ;;  %329 = vset.pattern.permute.xlu2 %v346_v1  ;;  %v24_v6 = vrot.slane %v11_v2, 3  ;;  %v16_v33 = vld [vmem:[%s614_s1 + $0x20] sm:$0xff]  ;;  %v19_v38 = vld [vmem:[%s614_s1 + $0x38] sm:$0xff]  ;;  %v13_v55 = vld [vmem:[%s614_s1 + $0x8] sm:$0xff] }
   0x3   :  { %v23_v7 = vrot.slane %v11_v2, 2  ;;  %v22_v8 = vrot.slane %v11_v2, 1  ;;  %v25_v9 = vrot.slane %v11_v2, 4  ;;  %v27_v17 = vrot.slane %v11_v2, 6  ;;  %v12_v45 = vld [vmem:[%s614_s1] sm:$0xff] }
   0x4   :  { %v151_v10 = vadd.f32 1e-08, %v150_v3  ;;  %vm37_vm0 = vcmp.lt.s32.totalorder %v21_v4, %v29_v5  ;;  %v32_v11 = vperm.slane %v24_v6, 0  ;;  %v26_v18 = vrot.slane %v11_v2, 5 }
   0x5   :  { %v45_v12 = vsel %vm37_vm0, 1, %v346_v1  ;;  %v31_v13 = vperm.slane %v23_v7, 0  ;;  %v30_v14 = vperm.slane %v22_v8, 0  ;;  %v33_v15 = vperm.slane %v25_v9, 0 }
   0x6   :  { %154 = vperm.xlu0 %327, %v151_v10   ;;  %54 = vperm.xlu1 %328, %v45_v12   ;;  %vm40_vm1 = vcmp.lt.s32.totalorder %v21_v4, %v32_v11  ;;  %v28_v19 = vrot.slane %v11_v2, 7  ;;  %v35_v22 = vperm.slane %v27_v17, 0  ;;  %v34_v23 = vperm.slane %v26_v18, 0 }
   0x7   :  { %v48_v16 = vsel %vm40_vm1, 1, %v346_v1  ;;  %vm39_vm2 = vcmp.lt.s32.totalorder %v21_v4, %v31_v13  ;;  %vm38_vm3 = vcmp.lt.s32.totalorder %v21_v4, %v30_v14  ;;  %vm41_vm4 = vcmp.lt.s32.totalorder %v21_v4, %v33_v15 }
   0x8   :  { %63 = vperm.xlu2 %329, %v48_v16   ;;  %v47_v20 = vsel %vm39_vm2, 1, %v346_v1  ;;  %v46_v21 = vsel %vm38_vm3, 1, %v346_v1  ;;  %v49_v24 = vsel %vm41_vm4, 1, %v346_v1  ;;  %v36_v25 = vperm.slane %v28_v19, 0 }
   0x9   :  { %vm43_vm5 = vcmp.lt.s32.totalorder %v21_v4, %v35_v22  ;;  %vm42_vm6 = vcmp.lt.s32.totalorder %v21_v4, %v34_v23 }
   0xa   :  { %vm44_vm7 = vcmp.lt.s32.totalorder %v21_v4, %v36_v25  ;;  %v51_v26 = vsel %vm43_vm5, 1, %v346_v1  ;;  %v50_v27 = vsel %vm42_vm6, 1, %v346_v1 }
   0xb   :  { %v52_v28 = vsel %vm44_vm7, 1, %v346_v1 }
   0xe   :  { %60 = vperm.xlu1 %328, %v47_v20   ;;  %57 = vperm.xlu0 %327, %v46_v21  }
  0x10   :  { %66 = vperm.xlu2 %329, %v49_v24  }
  0x16   :  { %72 = vperm.xlu1 %328, %v51_v26   ;;  %69 = vperm.xlu0 %327, %v50_v27  }
  0x18   :  { %75 = vperm.xlu2 %329, %v52_v28   ;;  %v18_v28 = vld [vmem:[%s614_s1 + $0x30] sm:$0xff] }
  0x62   :  { %v64_v29 = vpop.permute.xlu2 %63 }
  0x63   :  { %vm80_vm8 = vcmp.eq.s32.totalorder %v64_v29, 1 }
  0x64   :  { %v88_v32 = vsel %vm80_vm8, %v15_v31, 0.0 }
  0x65   :  { %v115_v34 = vsel %vm93_vm9, %v88_v32, 0.0 }
  0x66   :  { %v116_v37 = vrot.slane %v115_v34, 4 }
  0x68   :  { %v117_v43 = vadd.f32 %v116_v37, %v115_v34 }
  0x6a   :  { %v67_v30 = vpop.permute.xlu2 %66  ;;  %v118_v50 = vrot.slane %v117_v43, 2 }
  0x6b   :  { %vm81_vm10 = vcmp.eq.s32.totalorder %v67_v30, 1 }
  0x6c   :  { %v89_v36 = vsel %vm81_vm10, %v16_v33, 0.0  ;;  %v119_v60 = vadd.f32 %v118_v50, %v117_v43 }
  0x6d   :  { %v122_v39 = vsel %vm93_vm9, %v89_v36, 0.0 }
  0x6e   :  { %v123_v44 = vrot.slane %v122_v39, 4  ;;  %v120_v7 = vrot.slane %v119_v60, 1 }
  0x70   :  { %v124_v51 = vadd.f32 %v123_v44, %v122_v39  ;;  %v421_v21 = vadd.f32 %v120_v7, %v119_v60 }
  0x72   :  { %v76_v35 = vpop.permute.xlu2 %75  ;;  %v125_v61 = vrot.slane %v124_v51, 2 }
  0x73   :  { %vm84_vm11 = vcmp.eq.s32.totalorder %v76_v35, 1 }
  0x74   :  { %v92_v40 = vsel %vm84_vm11, %v19_v38, 0.0  ;;  %v411_v8 = vadd.f32 %v125_v61, %v124_v51 }
  0x75   :  { %v143_v48 = vsel %vm93_vm9, %v92_v40, 0.0 }
  0x76   :  { %v144_v52 = vrot.slane %v143_v48, 4  ;;  %v127_v22 = vrot.slane %v411_v8, 1 }
  0x78   :  { %v376_v41 = vpop.permute.xlu0 %154  ;;  %v55_v42 = vpop.permute.xlu1 %54  ;;  %v145_v62 = vadd.f32 %v144_v52, %v143_v48 }
  0x79   :  { %330 = vrcp.f32 %v376_v41  ;;  %vm77_vm12 = vcmp.eq.s32.totalorder %v55_v42, 1  ;;  %v383_v46 = vrot.slane %v376_v41, 2  ;;  %v386_v47 = vrot.slane %v376_v41, 1 }
  0x7a   :  { %v85_v49 = vsel %vm77_vm12, %v12_v45, 0.0  ;;  %v399_v56 = vrot.slane %v376_v41, 6  ;;  %v146_v11 = vrot.slane %v145_v62, 2  ;;  %v182_v16 = vand.u32 2147483648, %v376_v41 }
  0x7b   :  { %332 = vrcp.f32 %v386_v47  ;;  %v94_v53 = vsel %vm93_vm9, %v85_v49, 0.0  ;;  %v180_v25 = vand.u32 2147483647, %v376_v41  ;;  %vm176_vm15 = vweird.f32 %v376_v41 }
  0x7c   :  { %334 = vrcp.f32 %v383_v46  ;;  %v95_v63 = vrot.slane %v94_v53, 4  ;;  %v424_v24 = vadd.f32 %v146_v11, %v145_v62  ;;  %v183_v31 = vor.u32 1.1754944e-38, %v182_v16 }
  0x7d   :  { %336 = vrcp.f32 %v399_v56  ;;  %v210_v32 = vand.u32 2147483647, %v383_v46  ;;  %vm206_vm1 = vweird.f32 %v383_v46  ;;  %v212_v35 = vand.u32 2147483648, %v383_v46 }
  0x7e   :  { %v96_v12 = vadd.f32 %v95_v63, %v94_v53  ;;  %v148_v39 = vrot.slane %v424_v24, 1  ;;  %vm439_vm2 = vcmp.eq.f32.partialorder %v180_v25, 8.507059e+37  ;;  %v195_v43 = vand.u32 2147483647, %v386_v47 }
  0x7f   :  { %v401_v57 = vpop.eup %330  ;;  %v445_v44 = vrot.slane %v376_v41, 3  ;;  %v451_v49 = vrot.slane %v376_v41, 4  ;;  %v455_v53 = vrot.slane %v376_v41, 5  ;;  %v462_v60 = vrot.slane %v376_v41, 7 }
  0x80   :  { %v61_v58 = vpop.permute.xlu1 %60  ;;  %v58_v59 = vpop.permute.xlu0 %57  ;;  %v172_v3 = vmul.f32 %v401_v57, %v376_v41  ;;  %v97_v26 = vrot.slane %v96_v12, 2  ;;  %vm177_vm3 = vweird.f32 %v401_v57  ;;  %vm191_vm7 = vweird.f32 %v386_v47 }
  0x81   :  { %vm79_vm13 = vcmp.eq.s32.totalorder %v61_v58, 1  ;;  %vm78_vm14 = vcmp.eq.s32.totalorder %v58_v59, 1  ;;  %v403_v2 = vpop.eup %332  ;;  %338 = vrcp.f32 %v445_v44  ;;  %v197_v59 = vand.u32 2147483648, %v386_v47  ;;  %vm469_vm5 = vmor %vm176_vm15, %vm177_vm3 }
  0x82   :  { %v87_v0 = vsel %vm79_vm13, %v14_v54, 0.0  ;;  %v86_v1 = vsel %vm78_vm14, %v13_v55, 0.0  ;;  %v409_v5 = vpop.eup %334  ;;  %v187_v9 = vmul.f32 %v403_v2, %v386_v47  ;;  %v173_v14 = vsub.f32 1.0, %v172_v3 }
  0x83   :  { %v108_v4 = vsel %vm93_vm9, %v87_v0, 0.0  ;;  %v101_v10 = vsel %vm93_vm9, %v86_v1, 0.0  ;;  %v202_v15 = vmul.f32 %v409_v5, %v383_v46  ;;  %v419_v20 = vpop.eup %336  ;;  %v98_v42 = vadd.f32 %v97_v26, %v96_v12 }
  0x84   :  { %v109_v6 = vrot.slane %v108_v4, 4  ;;  %v102_v13 = vrot.slane %v101_v10, 4  ;;  %v188_v23 = vsub.f32 1.0, %v187_v9  ;;  %v174_v29 = vmul.f32 %v401_v57, %v173_v14 }
  0x85   :  { %v203_v30 = vsub.f32 1.0, %v202_v15  ;;  %v262_v34 = vmul.f32 %v419_v20, %v399_v56  ;;  %vm192_vm4 = vweird.f32 %v403_v2  ;;  %v99_v58 = vrot.slane %v98_v42, 1 }
  0x86   :  { %v110_v17 = vadd.f32 %v109_v6, %v108_v4  ;;  %v103_v18 = vadd.f32 %v102_v13, %v101_v10  ;;  %v189_v36 = vmul.f32 %v403_v2, %v188_v23  ;;  %v175_v45 = vadd.f32 %v401_v57, %v174_v29  ;;  %vm479_vm8 = vmor %vm191_vm7, %vm192_vm4 }
  0x87   :  { %v204_v48 = vmul.f32 %v409_v5, %v203_v30  ;;  %v263_v51 = vsub.f32 1.0, %v262_v34  ;;  %340 = vrcp.f32 %v451_v49  ;;  %vm207_vm6 = vweird.f32 %v409_v5  ;;  %v496_v10 = vpop.eup %338 }
  0x88   :  { %v73_v19 = vpop.permute.xlu1 %72  ;;  %v104_v27 = vrot.slane %v103_v18, 2  ;;  %v111_v33 = vrot.slane %v110_v17, 2  ;;  %v190_v54 = vadd.f32 %v403_v2, %v189_v36  ;;  %v179_v0 = vsel %vm469_vm5, %v401_v57, %v175_v45  ;;  %vm490_vm11 = vmor %vm206_vm1, %vm207_vm6  ;;  %v17_v36 = vld [vmem:[%s614_s1 + $0x28] sm:$0xff] }
  0x89   :  { %vm83_vm0 = vcmp.eq.s32.totalorder %v73_v19, 1  ;;  %v205_v62 = vadd.f32 %v409_v5, %v204_v48  ;;  %v264_v41 = vmul.f32 %v419_v20, %v263_v51  ;;  %342 = vrcp.f32 %v455_v53 }
  0x8a   :  { %v105_v37 = vadd.f32 %v104_v27, %v103_v18  ;;  %v91_v38 = vsel %vm83_vm0, %v18_v28, 0.0  ;;  %v112_v50 = vadd.f32 %v111_v33, %v110_v17  ;;  %v213_v4 = vor.u32 1.1754944e-38, %v212_v35  ;;  %v70_v33 = vpop.permute.xlu0 %69 }
  0x8b   :  { %v136_v52 = vsel %vm93_vm9, %v91_v38, 0.0  ;;  %v194_v6 = vsel %vm479_vm8, %v403_v2, %v190_v54  ;;  %vm196_vm10 = vcmp.eq.f32.partialorder %v195_v43, 8.507059e+37  ;;  %v100_v7 = vadd.f32 %v99_v58, %v98_v42 }
  0x8c   :  { %v106_v55 = vrot.slane %v105_v37, 1  ;;  %v137_v63 = vrot.slane %v136_v52, 4  ;;  %v113_v1 = vrot.slane %v112_v50, 1  ;;  %v198_v9 = vor.u32 1.1754944e-38, %v197_v59 }
  0x8d   :  { %vm267_vm12 = vweird.f32 %v419_v20  ;;  %344 = vrcp.f32 %v462_v60  ;;  %v184_v11 = vsel %vm439_vm2, %v183_v31, %v179_v0  ;;  %v209_v2 = vsel %vm490_vm11, %v409_v5, %v205_v62  ;;  %v504_v13 = vpop.eup %340 }
  0x8e   :  { %v107_v47 = vadd.f32 %v106_v55, %v105_v37  ;;  %v272_v46 = vand.u32 2147483648, %v399_v56  ;;  %v138_v12 = vadd.f32 %v137_v63, %v136_v52  ;;  %v114_v14 = vadd.f32 %v113_v1, %v112_v50 }
  0x8f   :  { %v199_v15 = vsel %vm196_vm10, %v198_v9, %v194_v6  ;;  %vm300_vm13 = vcmask 1041409   ;;  %v507_v16 = vadd.f32 %v419_v20, %v264_v41  ;;  %v217_v17 = vmul.f32 %v496_v10, %v445_v44  ;;  %v514_v19 = vpop.eup %342 }
  0x90   :  { %vm211_vm14 = vcmp.eq.f32.partialorder %v210_v32, 8.507059e+37  ;;  %v200_v18 = vmul.f32 %v199_v15, %v107_v47  ;;  %vm266_vm15 = vweird.f32 %v399_v56  ;;  %v232_v5 = vmul.f32 %v504_v13, %v451_v49 }
  0x91   :  { %v185_v23 = vmul.f32 %v184_v11, %v100_v7  ;;  %v214_v25 = vsel %vm211_vm14, %v213_v4, %v209_v2  ;;  %v270_v26 = vand.u32 2147483647, %v399_v56  ;;  %v218_v27 = vsub.f32 1.0, %v217_v17  ;;  %vm519_vm0 = vmor %vm266_vm15, %vm267_vm12 }
  0x92   :  { %v523_v29 = vor.u32 1.1754944e-38, %v272_v46  ;;  %v139_v30 = vrot.slane %v138_v12, 2  ;;  %v233_v31 = vsub.f32 1.0, %v232_v5  ;;  %v247_v32 = vmul.f32 %v514_v19, %v455_v53 }
  0x93   :  { %v527_v34 = vpop.eup %344  ;;  %v215_v35 = vmul.f32 %v214_v25, %v114_v14  ;;  %v269_v56 = vsel %vm519_vm0, %v419_v20, %v507_v16  ;;  %v219_v37 = vmul.f32 %v496_v10, %v218_v27  ;;  %v225_v38 = vand.u32 2147483647, %v445_v44 }
  0x94   :  { %v299_v40 = vrot.slane %v200_v18, 7  ;;  %v227_v42 = vand.u32 2147483648, %v445_v44  ;;  %v234_v43 = vmul.f32 %v504_v13, %v233_v31  ;;  %v277_v45 = vmul.f32 %v527_v34, %v462_v60 }
  0x95   :  { %vm303_vm1 = vcmask 1042434   ;;  %v220_v48 = vadd.f32 %v496_v10, %v219_v37  ;;  %vm222_vm2 = vweird.f32 %v496_v10  ;;  %v248_v20 = vsub.f32 1.0, %v247_v32 }
  0x96   :  { %vm82_vm3 = vcmp.eq.s32.totalorder %v70_v33, 1  ;;  %v140_v50 = vadd.f32 %v139_v30, %v138_v12  ;;  %v242_v51 = vand.u32 2147483648, %v451_v49  ;;  %v278_v52 = vsub.f32 1.0, %v277_v45 }
  0x97   :  { %v90_v54 = vsel %vm82_vm3, %v17_v36, 0.0  ;;  %v302_v55 = vrot.slane %v215_v35, 6  ;;  %vm545_vm4 = vcmp.eq.f32.partialorder %v270_v26, 8.507059e+37  ;;  %vm221_vm5 = vweird.f32 %v445_v44 }
  0x98   :  { %vm550_vm6 = vcmp.eq.f32.partialorder %v225_v38, 8.507059e+37  ;;  %v129_v61 = vsel %vm93_vm9, %v90_v54, 0.0  ;;  %vm555_vm7 = vmor %vm221_vm5, %vm222_vm2  ;;  %v235_v63 = vadd.f32 %v504_v13, %v234_v43  ;;  %vm236_vm8 = vweird.f32 %v451_v49 }
  0x99   :  { %vm237_vm10 = vweird.f32 %v504_v13  ;;  %v279_v0 = vmul.f32 %v527_v34, %v278_v52  ;;  %v224_v44 = vsel %vm555_vm7, %v496_v10, %v220_v48  ;;  %v240_v1 = vand.u32 2147483647, %v451_v49 }
  0x9a   :  { %v249_v3 = vmul.f32 %v514_v19, %v248_v20  ;;  %v130_v41 = vrot.slane %v129_v61, 4  ;;  %v301_v4 = vsel %vm300_vm13, %v299_v40, %v185_v23  ;;  %v141_v6 = vrot.slane %v140_v50, 1  ;;  %vm569_vm11 = vmor %vm236_vm8, %vm237_vm10 }
  0x9b   :  { %v228_v47 = vor.u32 1.1754944e-38, %v227_v42  ;;  %v243_v7 = vor.u32 1.1754944e-38, %v242_v51  ;;  %v257_v9 = vand.u32 2147483648, %v455_v53  ;;  %v280_v11 = vadd.f32 %v527_v34, %v279_v0 }
  0x9c   :  { %vm282_vm12 = vweird.f32 %v527_v34  ;;  %v131_v10 = vadd.f32 %v130_v41, %v129_v61  ;;  %v239_v2 = vsel %vm569_vm11, %v504_v13, %v235_v63  ;;  %vm281_vm13 = vweird.f32 %v462_v60 }
  0x9d   :  { %v229_v49 = vsel %vm550_vm6, %v228_v47, %v224_v44  ;;  %v287_v46 = vand.u32 2147483648, %v462_v60  ;;  %v250_v12 = vadd.f32 %v514_v19, %v249_v3  ;;  %vm252_vm14 = vweird.f32 %v514_v19  ;;  %vm588_vm2 = vmor %vm281_vm13, %vm282_vm12 }
  0x9e   :  { %v285_v14 = vand.u32 2147483647, %v462_v60  ;;  %v132_v15 = vrot.slane %v131_v10, 2  ;;  %v142_v16 = vadd.f32 %v141_v6, %v140_v50  ;;  %vm241_vm15 = vcmp.eq.f32.partialorder %v240_v1, 8.507059e+37 }
  0x9f   :  { %vm251_vm0 = vweird.f32 %v455_v53  ;;  %v255_v17 = vand.u32 2147483647, %v455_v53  ;;  %v230_v13 = vmul.f32 %v229_v49, %v421_v21  ;;  %v244_v5 = vsel %vm241_vm15, %v243_v7, %v239_v2 }
  0xa0   :  { %v284_v23 = vsel %vm588_vm2, %v527_v34, %v280_v11  ;;  %v133_v25 = vadd.f32 %v132_v15, %v131_v10  ;;  %v128_v60 = vadd.f32 %v127_v22, %v411_v8  ;;  %v304_v26 = vsel %vm303_vm1, %v302_v55, %v301_v4  ;;  %vm253_vm3 = vmor %vm251_vm0, %vm252_vm14 }
  0xa1   :  { %v274_v53 = vsel %vm545_vm4, %v523_v29, %v269_v56  ;;  %v288_v21 = vor.u32 1.1754944e-38, %v287_v46  ;;  %v254_v27 = vsel %vm253_vm3, %v514_v19, %v250_v12  ;;  %v258_v28 = vor.u32 1.1754944e-38, %v257_v9 }
  0xa2   :  { %vm286_vm5 = vcmp.eq.f32.partialorder %v285_v14, 8.507059e+37  ;;  %v134_v30 = vrot.slane %v133_v25, 1  ;;  %v275_v31 = vmul.f32 %v274_v53, %v142_v16  ;;  %v245_v32 = vmul.f32 %v244_v5, %v128_v60 }
  0xa3   :  { %v289_v33 = vsel %vm286_vm5, %v288_v21, %v284_v23  ;;  %vm306_vm6 = vcmask 1043459   ;;  %v149_v8 = vadd.f32 %v148_v39, %v424_v24  ;;  %vm256_vm1 = vcmp.eq.f32.partialorder %v255_v17, 8.507059e+37 }
  0xa4   :  { %v305_v22 = vrot.slane %v230_v13, 5  ;;  %v135_v29 = vadd.f32 %v134_v30, %v133_v25  ;;  %v259_v34 = vsel %vm256_vm1, %v258_v28, %v254_v27  ;;  %vm309_vm4 = vcmask 1044484  }
  0xa5   :  { %v290_v35 = vmul.f32 %v289_v33, %v149_v8  ;;  %v314_v19 = vrot.slane %v275_v31, 2  ;;  %v308_v37 = vrot.slane %v245_v32, 4  ;;  %vm312_vm7 = vcmask 1045509  }
  0xa6   :  { %v307_v56 = vsel %vm306_vm6, %v305_v22, %v304_v26  ;;  %v260_v36 = vmul.f32 %v259_v34, %v135_v29  ;;  %vm315_vm8 = vcmask 1046534   ;;  %vm318_vm10 = vcmask 1047559  }
  0xa7   :  { %v310_v40 = vsel %vm309_vm4, %v308_v37, %v307_v56  ;;  %v317_v42 = vrot.slane %v290_v35, 1 }
  0xa8   :  { %v311_v38 = vrot.slane %v260_v36, 3 }
  0xaa   :  { %v313_v43 = vsel %vm312_vm7, %v311_v38, %v310_v40 }
  0xab   :  { %v316_v45 = vsel %vm315_vm8, %v314_v19, %v313_v43 }
  0xac   :  { %v319_v48 = vsel %vm318_vm10, %v317_v42, %v316_v45 }
  0xad   :  { %321 = vst.msk [vmem:[%s615_s2] sm:$0xff] %vm93_vm9, %v319_v48 }

</bundles_post_ra>
